<compile_context>
chip_gen: v7x
topology: tpu7x:2x2x1
jax: 0.10.0
libtpu: 0.0.40
codegen_flags: <defaults>
</compile_context>

<pallas_src>
import functools

import jax
import jax.numpy as jnp
from jax import lax
from jax.experimental import pallas as pl
from jax.experimental.pallas import tpu as pltpu  # noqa: F401  (TPU-specific tuning hooks)


# --------------------------------------------------------------------------
# Single fused kernel: encoder -> hyperedge attrs -> per-head attention conv
# -> reassociated output head.  Everything is a full-array VMEM block.
# --------------------------------------------------------------------------
def _closegaps_kernel(xf_ref, h_ref, w_enc_ref, b_enc_ref, w_attr_ref, b_attr_ref,
                      w_lin_ref, blkx_ref, blke_ref, w_out_ref, bias_proj_ref,
                      b_out_ref, o_ref, *, heads, conv_dim):
    f32 = jnp.float32
    xf = xf_ref[...]                                   # (N, F)
    hm = h_ref[...]                                    # (N, M) incidence matrix

    # --- linear_encoder + ReLU ---------------------------------------------
    x = jnp.dot(xf, w_enc_ref[...], preferred_element_type=f32) + b_enc_ref[...]
    x = jnp.maximum(x, 0.0)                            # (N, emb)

    # --- hyper_attr_liner(H^T): H^T @ W_attr + b_attr (dim-0 contraction, no vxpose)
    ea = lax.dot_general(hm, w_attr_ref[...], (((0,), (0,)), ((), ())),
                         preferred_element_type=f32) + b_attr_ref[...]   # (M, emb)

    # --- shared HypergraphConv lin (bias=False) ------------------------------
    xl = jnp.dot(x, w_lin_ref[...], preferred_element_type=f32)          # (N, heads*C)
    al = jnp.dot(ea, w_lin_ref[...], preferred_element_type=f32)         # (M, heads*C)

    # --- batched attention logits for ALL heads (2 MXU pushes total) ---------
    sx_all = jnp.dot(xl, blkx_ref[...], preferred_element_type=f32)      # (N, heads)
    se_all = lax.dot_general(blke_ref[...], al, (((1,), (1,)), ((), ())),
                             preferred_element_type=f32)                 # (heads, M)

    # head-invariant incidence statistics; degrees via tiny MXU matmuls
    mask = (hm != 0.0).astype(f32)                     # (N, M)
    ones_m = jnp.ones((mask.shape[1], 1), f32)
    ones_n = jnp.ones((mask.shape[0], 1), f32)
    row_deg = jnp.dot(mask, ones_m, preferred_element_type=f32)          # (N, 1) node degree D
    col_deg = lax.dot_general(mask, ones_n, (((0,), (0,)), ((), ())),
                              preferred_element_type=f32)                # (M, 1) edge degree B
    d_inv = jnp.where(row_deg > 0, pl.reciprocal(row_deg, approx=True), 0.0)
    b_inv = jnp.where(col_deg > 0, pl.reciprocal(col_deg, approx=True), 0.0)
    neg = jnp.float32(-1e30)

    w_out = w_out_ref[...]                             # (heads*C, 2)

    z = None                                           # accumulates node_feats @ W_out : (N, 2)
    for h in range(heads):                             # heads is small & static -> unrolled
        lo = h * conv_dim
        x_h = xl[:, lo:lo + conv_dim]                  # (N, C)

        # attention logits: s[n, e] = <x_h[n], att_x_h> + <a_h[e], att_e_h>
        s = sx_all[:, h:h + 1] + se_all[h:h + 1, :]    # (N, M)
        s = jnp.where(s > 0, s, 0.2 * s)               # leaky_relu(0.2)

        # masked softmax over nodes within each hyperedge (columns)
        sm = jnp.where(mask > 0, s, neg)
        col_max = jnp.max(sm, axis=0, keepdims=True)                     # (1, M)
        col_max = jnp.where(col_max > -1e29, col_max, 0.0)               # empty-column guard
        e = jnp.exp(sm - col_max)                      # masked entries underflow to exactly 0
        denom = jnp.sum(e, axis=0, keepdims=True)                        # (1, M)
        alpha = e * jnp.where(denom > 0, pl.reciprocal(denom, approx=True), 0.0)

        # node -> edge; B^-1 applied to the small (M,C) result, not the (N,M) alpha
        edge_out = lax.dot_general(alpha, x_h, (((0,), (0,)), ((), ())),
                                   preferred_element_type=f32) * b_inv   # (M, C)
        # edge -> node
        node_out = d_inv * jnp.dot(alpha, edge_out, preferred_element_type=f32)  # (N, C)

        # fold this head's W_out slice here instead of concatenating heads
        zh = jnp.dot(node_out, w_out[lo:lo + conv_dim, :],
                     preferred_element_type=f32)                         # (N, 2)
        z = zh if z is None else z + zh

    # per-node conv bias pre-projected through W_out on the host
    z = z + bias_proj_ref[...]                         # (N, 2)

    # out^T = z^T @ H + b_out^T  : lane-dense (2, M) store, wrapper transposes back
    out_t = lax.dot_general(z, hm, (((0,), (0,)), ((), ())),
                            preferred_element_type=f32) + b_out_ref[...]  # (2, M)
    o_ref[...] = out_t.astype(o_ref.dtype)


# --------------------------------------------------------------------------
# Wrapper: casts / reshapes params, builds the block-diagonal attention
# matrices and the pre-projected conv bias, launches the single fused kernel.
# --------------------------------------------------------------------------
def closegaps_forward(params, input_features, incidence_matrix):
    m_edges = incidence_matrix.shape[1]
    heads = params["heads"]
    conv_dim = params["conv_dim"]
    f32 = jnp.float32

    att = params["att"].reshape(heads, 2 * conv_dim).astype(f32)
    att_x, att_e = att[:, :conv_dim], att[:, conv_dim:]
    eye = jnp.eye(heads, dtype=f32)
    # block-diagonal layouts: one MXU push gives all heads' logits
    blk_x = (att_x[:, :, None] * eye[:, None, :]).reshape(heads * conv_dim, heads)  # (H*C, H)
    blk_e = (eye[:, :, None] * att_e[None, :, :]).reshape(heads, heads * conv_dim)  # (H, H*C)

    w_out = params["W_out"].astype(f32)                                  # (H*C, 2)
    bias_proj = params["conv_bias"].reshape(1, heads * conv_dim).astype(f32) @ w_out  # (1, 2)

    args = (
        input_features.astype(f32),                              # (N, F)
        incidence_matrix.astype(f32),                            # (N, M)
        params["W_enc"].astype(f32),                             # (F, emb)
        params["b_enc"].reshape(1, -1).astype(f32),              # (1, emb)
        params["W_attr"].astype(f32),                            # (N, emb)
        params["b_attr"].reshape(1, -1).astype(f32),             # (1, emb)
        params["W_lin"].astype(f32),                             # (emb, heads*C)
        blk_x,                                                   # (heads*C, heads)
        blk_e,                                                   # (heads, heads*C)
        w_out,                                                   # (heads*C, 2)
        bias_proj,                                               # (1, 2)
        params["b_out"].reshape(2, 1).astype(f32),               # (2, 1)
    )
    out_t = pl.pallas_call(
        functools.partial(_closegaps_kernel, heads=heads, conv_dim=conv_dim),
        out_shape=jax.ShapeDtypeStruct((2, m_edges), f32),
    )(*args)
    return out_t.T                                               # (M, 2)


# --------------------------------------------------------------------------
# Pure-JAX reference (same math, un-fused) for correctness checking.
# --------------------------------------------------------------------------
def closegaps_reference(params, x_in, hmat):
    heads = params["heads"]
    c = params["conv_dim"]
    x = jnp.maximum(x_in @ params["W_enc"] + params["b_enc"], 0.0)
    ht = hmat.T
    ea = ht @ params["W_attr"] + params["b_attr"]
    xl = x @ params["W_lin"]
    al = ea @ params["W_lin"]
    mask = (hmat != 0).astype(jnp.float32)
    col_deg = mask.sum(0, keepdims=True)
    b_inv = jnp.where(col_deg > 0, 1.0 / col_deg, 0.0)
    row_deg = mask.sum(1, keepdims=True)
    d_inv = jnp.where(row_deg > 0, 1.0 / row_deg, 0.0)
    att = params["att"].reshape(heads, 2 * c)
    parts = []
    for h in range(heads):
        x_h = xl[:, h * c:(h + 1) * c]
        a_h = al[:, h * c:(h + 1) * c]
        sx = (x_h * att[h, :c]).sum(1, keepdims=True)
        se = (a_h * att[h, c:]).sum(1, keepdims=True)
        s = sx + se.T
        s = jnp.where(s > 0, s, 0.2 * s)
        sm = jnp.where(mask > 0, s, -1e30)
        cmax = jnp.where(col_deg > 0, sm.max(0, keepdims=True), 0.0)
        e = jnp.exp(sm - cmax) * mask
        den = e.sum(0, keepdims=True)
        alpha = e * jnp.where(den > 0, 1.0 / den, 0.0)
        edge_out = (alpha * b_inv).T @ x_h
        node_out = d_inv * (alpha @ edge_out) + params["conv_bias"][h * c:(h + 1) * c]
        parts.append(node_out)
    nf = jnp.concatenate(parts, axis=1)
    return (ht @ nf) @ params["W_out"] + params["b_out"]


def init_params(key, input_num, input_feature_num, emb_dim, conv_dim, heads):
    ks = jax.random.split(key, 9)
    sc = 0.1
    return {
        "heads": heads,
        "conv_dim": conv_dim,
        "W_enc": sc * jax.random.normal(ks[0], (input_feature_num, emb_dim), jnp.float32),
        "b_enc": sc * jax.random.normal(ks[1], (emb_dim,), jnp.float32),
        "W_attr": sc * jax.random.normal(ks[2], (input_num, emb_dim), jnp.float32),
        "b_attr": sc * jax.random.normal(ks[3], (emb_dim,), jnp.float32),
        "W_lin": sc * jax.random.normal(ks[4], (emb_dim, heads * conv_dim), jnp.float32),
        "att": sc * jax.random.normal(ks[5], (heads, 2 * conv_dim), jnp.float32),
        "conv_bias": sc * jax.random.normal(ks[6], (heads * conv_dim,), jnp.float32),
        "W_out": sc * jax.random.normal(ks[7], (heads * conv_dim, 2), jnp.float32),
        "b_out": sc * jax.random.normal(ks[8], (2,), jnp.float32),
    }


if __name__ == "__main__":
    # small shapes consistent with the module's forward
    input_num = 16          # N: number of nodes (metabolites)
    input_feature_num = 12  # F: per-node input features
    emb_dim = 32
    conv_dim = 16
    heads = 3
    m_edges = 10            # M: number of hyperedges (reactions)

    key = jax.random.PRNGKey(0)
    k_feat, k_inc, k_param = jax.random.split(key, 3)

    input_features = jax.random.normal(k_feat, (input_num, input_feature_num), jnp.float32)
    # binary incidence matrix, guaranteed no empty hyperedge / isolated node
    inc = (jax.random.uniform(k_inc, (input_num, m_edges)) < 0.35).astype(jnp.float32)
    inc = inc.at[jnp.arange(m_edges) % input_num, jnp.arange(m_edges)].set(1.0)
    inc = inc.at[jnp.arange(input_num), jnp.arange(input_num) % m_edges].set(1.0)

    params = init_params(k_param, input_num, input_feature_num, emb_dim, conv_dim, heads)

    out = closegaps_forward(params, input_features, inc)
    out = jax.block_until_ready(out)
    ref = jax.block_until_ready(closegaps_reference(params, input_features, inc))

    assert out.shape == (m_edges, 2) and out.dtype == jnp.float32
    assert bool(jnp.all(jnp.isfinite(out)))
    # tolerance accounts for pl.reciprocal(approx=True) in B^-1 / D^-1 / softmax denom
    assert bool(jnp.allclose(out, ref, atol=2e-3, rtol=2e-3))
    print("KERNEL_OK")
</pallas_src>

<mosaic_0001>
module attributes {stable_mosaic.version = 11 : i64} {
  func.func @_closegaps_kernel(%arg0: memref<16x12xf32, #tpu.memory_space<vmem>>, %arg1: memref<16x10xf32, #tpu.memory_space<vmem>>, %arg2: memref<12x32xf32, #tpu.memory_space<vmem>>, %arg3: memref<1x32xf32, #tpu.memory_space<vmem>>, %arg4: memref<16x32xf32, #tpu.memory_space<vmem>>, %arg5: memref<1x32xf32, #tpu.memory_space<vmem>>, %arg6: memref<32x48xf32, #tpu.memory_space<vmem>>, %arg7: memref<48x3xf32, #tpu.memory_space<vmem>>, %arg8: memref<3x48xf32, #tpu.memory_space<vmem>>, %arg9: memref<48x2xf32, #tpu.memory_space<vmem>>, %arg10: memref<1x2xf32, #tpu.memory_space<vmem>>, %arg11: memref<2x1xf32, #tpu.memory_space<vmem>>, %arg12: memref<2x10xf32, #tpu.memory_space<vmem>>) attributes {dimension_semantics = [], scalar_prefetch = 0 : i64, scratch_operands = 0 : i64, tpu.core_type = #tpu.core_type<tc>} {
    %c0 = arith.constant 0 : index
    %c0_0 = arith.constant 0 : index
    %0 = vector.load %arg0[%c0, %c0_0] : memref<16x12xf32, #tpu.memory_space<vmem>>, vector<16x12xf32>
    %c0_1 = arith.constant 0 : index
    %c0_2 = arith.constant 0 : index
    %1 = vector.load %arg1[%c0_1, %c0_2] : memref<16x10xf32, #tpu.memory_space<vmem>>, vector<16x10xf32>
    %c0_3 = arith.constant 0 : index
    %c0_4 = arith.constant 0 : index
    %2 = vector.load %arg2[%c0_3, %c0_4] : memref<12x32xf32, #tpu.memory_space<vmem>>, vector<12x32xf32>
    %cst = arith.constant dense<0.000000e+00> : vector<16x32xf32>
    %3 = tpu.matmul %0, %2, %cst {dimension_numbers = #tpu.dot_dimension_numbers<[1], [0], [0], [1], [0, 0, 1, 1], [], []>} : vector<16x12xf32>, vector<12x32xf32>, vector<16x32xf32> -> vector<16x32xf32>
    %c0_5 = arith.constant 0 : index
    %c0_6 = arith.constant 0 : index
    %4 = vector.load %arg3[%c0_5, %c0_6] : memref<1x32xf32, #tpu.memory_space<vmem>>, vector<1x32xf32>
    %5 = vector.broadcast %4 : vector<1x32xf32> to vector<16x32xf32>
    %6 = arith.addf %3, %5 : vector<16x32xf32>
    %cst_7 = arith.constant 0.000000e+00 : f32
    %7 = vector.broadcast %cst_7 : f32 to vector<16x32xf32>
    %8 = arith.maximumf %6, %7 : vector<16x32xf32>
    %c0_8 = arith.constant 0 : index
    %c0_9 = arith.constant 0 : index
    %9 = vector.load %arg4[%c0_8, %c0_9] : memref<16x32xf32, #tpu.memory_space<vmem>>, vector<16x32xf32>
    %cst_10 = arith.constant dense<0.000000e+00> : vector<10x32xf32>
    %10 = tpu.matmul %1, %9, %cst_10 {dimension_numbers = #tpu.dot_dimension_numbers<[0], [0], [1], [1], [0, 1, 1, 1], [], []>} : vector<16x10xf32>, vector<16x32xf32>, vector<10x32xf32> -> vector<10x32xf32>
    %c0_11 = arith.constant 0 : index
    %c0_12 = arith.constant 0 : index
    %11 = vector.load %arg5[%c0_11, %c0_12] : memref<1x32xf32, #tpu.memory_space<vmem>>, vector<1x32xf32>
    %12 = vector.broadcast %11 : vector<1x32xf32> to vector<10x32xf32>
    %13 = arith.addf %10, %12 : vector<10x32xf32>
    %c0_13 = arith.constant 0 : index
    %c0_14 = arith.constant 0 : index
    %14 = vector.load %arg6[%c0_13, %c0_14] : memref<32x48xf32, #tpu.memory_space<vmem>>, vector<32x48xf32>
    %cst_15 = arith.constant dense<0.000000e+00> : vector<16x48xf32>
    %15 = tpu.matmul %8, %14, %cst_15 {dimension_numbers = #tpu.dot_dimension_numbers<[1], [0], [0], [1], [0, 0, 1, 1], [], []>} : vector<16x32xf32>, vector<32x48xf32>, vector<16x48xf32> -> vector<16x48xf32>
    %c0_16 = arith.constant 0 : index
    %c0_17 = arith.constant 0 : index
    %16 = vector.load %arg6[%c0_16, %c0_17] : memref<32x48xf32, #tpu.memory_space<vmem>>, vector<32x48xf32>
    %cst_18 = arith.constant dense<0.000000e+00> : vector<10x48xf32>
    %17 = tpu.matmul %13, %16, %cst_18 {dimension_numbers = #tpu.dot_dimension_numbers<[1], [0], [0], [1], [0, 0, 1, 1], [], []>} : vector<10x32xf32>, vector<32x48xf32>, vector<10x48xf32> -> vector<10x48xf32>
    %c0_19 = arith.constant 0 : index
    %c0_20 = arith.constant 0 : index
    %18 = vector.load %arg7[%c0_19, %c0_20] : memref<48x3xf32, #tpu.memory_space<vmem>>, vector<48x3xf32>
    %cst_21 = arith.constant dense<0.000000e+00> : vector<16x3xf32>
    %19 = tpu.matmul %15, %18, %cst_21 {dimension_numbers = #tpu.dot_dimension_numbers<[1], [0], [0], [1], [0, 0, 1, 1], [], []>} : vector<16x48xf32>, vector<48x3xf32>, vector<16x3xf32> -> vector<16x3xf32>
    %c0_22 = arith.constant 0 : index
    %c0_23 = arith.constant 0 : index
    %20 = vector.load %arg8[%c0_22, %c0_23] : memref<3x48xf32, #tpu.memory_space<vmem>>, vector<3x48xf32>
    %cst_24 = arith.constant dense<0.000000e+00> : vector<3x10xf32>
    %21 = tpu.matmul %20, %17, %cst_24 {dimension_numbers = #tpu.dot_dimension_numbers<[1], [1], [0], [0], [0, 0, 1, 0], [], []>} : vector<3x48xf32>, vector<10x48xf32>, vector<3x10xf32> -> vector<3x10xf32>
    %cst_25 = arith.constant 0.000000e+00 : f32
    %22 = vector.broadcast %cst_25 : f32 to vector<16x10xf32>
    %23 = arith.cmpf one, %1, %22 : vector<16x10xf32>
    %24 = arith.extui %23 : vector<16x10xi1> to vector<16x10xi32>
    %25 = arith.sitofp %24 : vector<16x10xi32> to vector<16x10xf32>
    %cst_26 = arith.constant 1.000000e+00 : f32
    %26 = vector.broadcast %cst_26 : f32 to vector<10x1xf32>
    %cst_27 = arith.constant 1.000000e+00 : f32
    %27 = vector.broadcast %cst_27 : f32 to vector<16x1xf32>
    %cst_28 = arith.constant dense<0.000000e+00> : vector<16x1xf32>
    %28 = tpu.matmul %25, %26, %cst_28 {dimension_numbers = #tpu.dot_dimension_numbers<[1], [0], [0], [1], [0, 0, 1, 1], [], []>} : vector<16x10xf32>, vector<10x1xf32>, vector<16x1xf32> -> vector<16x1xf32>
    %cst_29 = arith.constant dense<0.000000e+00> : vector<10x1xf32>
    %29 = tpu.matmul %25, %27, %cst_29 {dimension_numbers = #tpu.dot_dimension_numbers<[0], [0], [1], [1], [0, 1, 1, 1], [], []>} : vector<16x10xf32>, vector<16x1xf32>, vector<10x1xf32> -> vector<10x1xf32>
    %cst_30 = arith.constant 0.000000e+00 : f32
    %30 = vector.broadcast %cst_30 : f32 to vector<16x1xf32>
    %31 = arith.cmpf ogt, %28, %30 : vector<16x1xf32>
    %32 = tpu.reciprocal %28 {approx = true} : vector<16x1xf32> -> vector<16x1xf32>
    %cst_31 = arith.constant 0.000000e+00 : f32
    %33 = vector.broadcast %cst_31 : f32 to vector<16x1xf32>
    %34 = arith.select %31, %32, %33 : vector<16x1xi1>, vector<16x1xf32>
    %cst_32 = arith.constant 0.000000e+00 : f32
    %35 = vector.broadcast %cst_32 : f32 to vector<10x1xf32>
    %36 = arith.cmpf ogt, %29, %35 : vector<10x1xf32>
    %37 = tpu.reciprocal %29 {approx = true} : vector<10x1xf32> -> vector<10x1xf32>
    %cst_33 = arith.constant 0.000000e+00 : f32
    %38 = vector.broadcast %cst_33 : f32 to vector<10x1xf32>
    %39 = arith.select %36, %37, %38 : vector<10x1xi1>, vector<10x1xf32>
    %c0_34 = arith.constant 0 : index
    %c0_35 = arith.constant 0 : index
    %40 = vector.load %arg9[%c0_34, %c0_35] : memref<48x2xf32, #tpu.memory_space<vmem>>, vector<48x2xf32>
    %41 = vector.extract_strided_slice %15 {offsets = [0, 0], sizes = [16, 16], strides = [1, 1]} : vector<16x48xf32> to vector<16x16xf32>
    %42 = vector.extract_strided_slice %19 {offsets = [0, 0], sizes = [16, 1], strides = [1, 1]} : vector<16x3xf32> to vector<16x1xf32>
    %43 = vector.extract_strided_slice %21 {offsets = [0, 0], sizes = [1, 10], strides = [1, 1]} : vector<3x10xf32> to vector<1x10xf32>
    %44 = vector.broadcast %42 : vector<16x1xf32> to vector<16x10xf32>
    %45 = vector.broadcast %43 : vector<1x10xf32> to vector<16x10xf32>
    %46 = arith.addf %44, %45 : vector<16x10xf32>
    %cst_36 = arith.constant 0.000000e+00 : f32
    %47 = vector.broadcast %cst_36 : f32 to vector<16x10xf32>
    %48 = arith.cmpf ogt, %46, %47 : vector<16x10xf32>
    %cst_37 = arith.constant 2.000000e-01 : f32
    %49 = vector.broadcast %cst_37 : f32 to vector<16x10xf32>
    %50 = arith.mulf %49, %46 : vector<16x10xf32>
    %51 = arith.select %48, %46, %50 : vector<16x10xi1>, vector<16x10xf32>
    %cst_38 = arith.constant 0.000000e+00 : f32
    %52 = vector.broadcast %cst_38 : f32 to vector<16x10xf32>
    %53 = arith.cmpf ogt, %25, %52 : vector<16x10xf32>
    %cst_39 = arith.constant -1.000000e+30 : f32
    %54 = vector.broadcast %cst_39 : f32 to vector<16x10xf32>
    %55 = arith.select %53, %51, %54 : vector<16x10xi1>, vector<16x10xf32>
    %cst_40 = arith.constant dense<0xFF800000> : vector<10xf32>
    %56 = vector.multi_reduction <maximumf>, %55, %cst_40 [0] : vector<16x10xf32> to vector<10xf32>
    %57 = vector.shape_cast %56 : vector<10xf32> to vector<1x10xf32>
    %cst_41 = arith.constant -1.000000e+29 : f32
    %58 = vector.broadcast %cst_41 : f32 to vector<1x10xf32>
    %59 = arith.cmpf ogt, %57, %58 : vector<1x10xf32>
    %cst_42 = arith.constant 0.000000e+00 : f32
    %60 = vector.broadcast %cst_42 : f32 to vector<1x10xf32>
    %61 = arith.select %59, %57, %60 : vector<1x10xi1>, vector<1x10xf32>
    %62 = vector.broadcast %61 : vector<1x10xf32> to vector<16x10xf32>
    %63 = arith.subf %55, %62 : vector<16x10xf32>
    %64 = math.exp %63 : vector<16x10xf32>
    %cst_43 = arith.constant dense<0.000000e+00> : vector<10xf32>
    %65 = vector.multi_reduction <add>, %64, %cst_43 [0] : vector<16x10xf32> to vector<10xf32>
    %66 = vector.shape_cast %65 : vector<10xf32> to vector<1x10xf32>
    %cst_44 = arith.constant 0.000000e+00 : f32
    %67 = vector.broadcast %cst_44 : f32 to vector<1x10xf32>
    %68 = arith.cmpf ogt, %66, %67 : vector<1x10xf32>
    %69 = tpu.reciprocal %66 {approx = true} : vector<1x10xf32> -> vector<1x10xf32>
    %cst_45 = arith.constant 0.000000e+00 : f32
    %70 = vector.broadcast %cst_45 : f32 to vector<1x10xf32>
    %71 = arith.select %68, %69, %70 : vector<1x10xi1>, vector<1x10xf32>
    %72 = vector.broadcast %71 : vector<1x10xf32> to vector<16x10xf32>
    %73 = arith.mulf %64, %72 : vector<16x10xf32>
    %cst_46 = arith.constant dense<0.000000e+00> : vector<10x16xf32>
    %74 = tpu.matmul %73, %41, %cst_46 {dimension_numbers = #tpu.dot_dimension_numbers<[0], [0], [1], [1], [0, 1, 1, 1], [], []>} : vector<16x10xf32>, vector<16x16xf32>, vector<10x16xf32> -> vector<10x16xf32>
    %75 = vector.broadcast %39 : vector<10x1xf32> to vector<10x16xf32>
    %76 = arith.mulf %74, %75 : vector<10x16xf32>
    %cst_47 = arith.constant dense<0.000000e+00> : vector<16x16xf32>
    %77 = tpu.matmul %73, %76, %cst_47 {dimension_numbers = #tpu.dot_dimension_numbers<[1], [0], [0], [1], [0, 0, 1, 1], [], []>} : vector<16x10xf32>, vector<10x16xf32>, vector<16x16xf32> -> vector<16x16xf32>
    %78 = vector.broadcast %34 : vector<16x1xf32> to vector<16x16xf32>
    %79 = arith.mulf %78, %77 : vector<16x16xf32>
    %80 = vector.extract_strided_slice %40 {offsets = [0, 0], sizes = [16, 2], strides = [1, 1]} : vector<48x2xf32> to vector<16x2xf32>
    %cst_48 = arith.constant dense<0.000000e+00> : vector<16x2xf32>
    %81 = tpu.matmul %79, %80, %cst_48 {dimension_numbers = #tpu.dot_dimension_numbers<[1], [0], [0], [1], [0, 0, 1, 1], [], []>} : vector<16x16xf32>, vector<16x2xf32>, vector<16x2xf32> -> vector<16x2xf32>
    %82 = vector.extract_strided_slice %15 {offsets = [0, 16], sizes = [16, 16], strides = [1, 1]} : vector<16x48xf32> to vector<16x16xf32>
    %83 = vector.extract_strided_slice %19 {offsets = [0, 1], sizes = [16, 1], strides = [1, 1]} : vector<16x3xf32> to vector<16x1xf32>
    %84 = vector.extract_strided_slice %21 {offsets = [1, 0], sizes = [1, 10], strides = [1, 1]} : vector<3x10xf32> to vector<1x10xf32>
    %85 = vector.broadcast %83 : vector<16x1xf32> to vector<16x10xf32>
    %86 = vector.broadcast %84 : vector<1x10xf32> to vector<16x10xf32>
    %87 = arith.addf %85, %86 : vector<16x10xf32>
    %cst_49 = arith.constant 0.000000e+00 : f32
    %88 = vector.broadcast %cst_49 : f32 to vector<16x10xf32>
    %89 = arith.cmpf ogt, %87, %88 : vector<16x10xf32>
    %cst_50 = arith.constant 2.000000e-01 : f32
    %90 = vector.broadcast %cst_50 : f32 to vector<16x10xf32>
    %91 = arith.mulf %90, %87 : vector<16x10xf32>
    %92 = arith.select %89, %87, %91 : vector<16x10xi1>, vector<16x10xf32>
    %cst_51 = arith.constant 0.000000e+00 : f32
    %93 = vector.broadcast %cst_51 : f32 to vector<16x10xf32>
    %94 = arith.cmpf ogt, %25, %93 : vector<16x10xf32>
    %cst_52 = arith.constant -1.000000e+30 : f32
    %95 = vector.broadcast %cst_52 : f32 to vector<16x10xf32>
    %96 = arith.select %94, %92, %95 : vector<16x10xi1>, vector<16x10xf32>
    %cst_53 = arith.constant dense<0xFF800000> : vector<10xf32>
    %97 = vector.multi_reduction <maximumf>, %96, %cst_53 [0] : vector<16x10xf32> to vector<10xf32>
    %98 = vector.shape_cast %97 : vector<10xf32> to vector<1x10xf32>
    %cst_54 = arith.constant -1.000000e+29 : f32
    %99 = vector.broadcast %cst_54 : f32 to vector<1x10xf32>
    %100 = arith.cmpf ogt, %98, %99 : vector<1x10xf32>
    %cst_55 = arith.constant 0.000000e+00 : f32
    %101 = vector.broadcast %cst_55 : f32 to vector<1x10xf32>
    %102 = arith.select %100, %98, %101 : vector<1x10xi1>, vector<1x10xf32>
    %103 = vector.broadcast %102 : vector<1x10xf32> to vector<16x10xf32>
    %104 = arith.subf %96, %103 : vector<16x10xf32>
    %105 = math.exp %104 : vector<16x10xf32>
    %cst_56 = arith.constant dense<0.000000e+00> : vector<10xf32>
    %106 = vector.multi_reduction <add>, %105, %cst_56 [0] : vector<16x10xf32> to vector<10xf32>
    %107 = vector.shape_cast %106 : vector<10xf32> to vector<1x10xf32>
    %cst_57 = arith.constant 0.000000e+00 : f32
    %108 = vector.broadcast %cst_57 : f32 to vector<1x10xf32>
    %109 = arith.cmpf ogt, %107, %108 : vector<1x10xf32>
    %110 = tpu.reciprocal %107 {approx = true} : vector<1x10xf32> -> vector<1x10xf32>
    %cst_58 = arith.constant 0.000000e+00 : f32
    %111 = vector.broadcast %cst_58 : f32 to vector<1x10xf32>
    %112 = arith.select %109, %110, %111 : vector<1x10xi1>, vector<1x10xf32>
    %113 = vector.broadcast %112 : vector<1x10xf32> to vector<16x10xf32>
    %114 = arith.mulf %105, %113 : vector<16x10xf32>
    %cst_59 = arith.constant dense<0.000000e+00> : vector<10x16xf32>
    %115 = tpu.matmul %114, %82, %cst_59 {dimension_numbers = #tpu.dot_dimension_numbers<[0], [0], [1], [1], [0, 1, 1, 1], [], []>} : vector<16x10xf32>, vector<16x16xf32>, vector<10x16xf32> -> vector<10x16xf32>
    %116 = vector.broadcast %39 : vector<10x1xf32> to vector<10x16xf32>
    %117 = arith.mulf %115, %116 : vector<10x16xf32>
    %cst_60 = arith.constant dense<0.000000e+00> : vector<16x16xf32>
    %118 = tpu.matmul %114, %117, %cst_60 {dimension_numbers = #tpu.dot_dimension_numbers<[1], [0], [0], [1], [0, 0, 1, 1], [], []>} : vector<16x10xf32>, vector<10x16xf32>, vector<16x16xf32> -> vector<16x16xf32>
    %119 = vector.broadcast %34 : vector<16x1xf32> to vector<16x16xf32>
    %120 = arith.mulf %119, %118 : vector<16x16xf32>
    %121 = vector.extract_strided_slice %40 {offsets = [16, 0], sizes = [16, 2], strides = [1, 1]} : vector<48x2xf32> to vector<16x2xf32>
    %cst_61 = arith.constant dense<0.000000e+00> : vector<16x2xf32>
    %122 = tpu.matmul %120, %121, %cst_61 {dimension_numbers = #tpu.dot_dimension_numbers<[1], [0], [0], [1], [0, 0, 1, 1], [], []>} : vector<16x16xf32>, vector<16x2xf32>, vector<16x2xf32> -> vector<16x2xf32>
    %123 = arith.addf %81, %122 : vector<16x2xf32>
    %124 = vector.extract_strided_slice %15 {offsets = [0, 32], sizes = [16, 16], strides = [1, 1]} : vector<16x48xf32> to vector<16x16xf32>
    %125 = vector.extract_strided_slice %19 {offsets = [0, 2], sizes = [16, 1], strides = [1, 1]} : vector<16x3xf32> to vector<16x1xf32>
    %126 = vector.extract_strided_slice %21 {offsets = [2, 0], sizes = [1, 10], strides = [1, 1]} : vector<3x10xf32> to vector<1x10xf32>
    %127 = vector.broadcast %125 : vector<16x1xf32> to vector<16x10xf32>
    %128 = vector.broadcast %126 : vector<1x10xf32> to vector<16x10xf32>
    %129 = arith.addf %127, %128 : vector<16x10xf32>
    %cst_62 = arith.constant 0.000000e+00 : f32
    %130 = vector.broadcast %cst_62 : f32 to vector<16x10xf32>
    %131 = arith.cmpf ogt, %129, %130 : vector<16x10xf32>
    %cst_63 = arith.constant 2.000000e-01 : f32
    %132 = vector.broadcast %cst_63 : f32 to vector<16x10xf32>
    %133 = arith.mulf %132, %129 : vector<16x10xf32>
    %134 = arith.select %131, %129, %133 : vector<16x10xi1>, vector<16x10xf32>
    %cst_64 = arith.constant 0.000000e+00 : f32
    %135 = vector.broadcast %cst_64 : f32 to vector<16x10xf32>
    %136 = arith.cmpf ogt, %25, %135 : vector<16x10xf32>
    %cst_65 = arith.constant -1.000000e+30 : f32
    %137 = vector.broadcast %cst_65 : f32 to vector<16x10xf32>
    %138 = arith.select %136, %134, %137 : vector<16x10xi1>, vector<16x10xf32>
    %cst_66 = arith.constant dense<0xFF800000> : vector<10xf32>
    %139 = vector.multi_reduction <maximumf>, %138, %cst_66 [0] : vector<16x10xf32> to vector<10xf32>
    %140 = vector.shape_cast %139 : vector<10xf32> to vector<1x10xf32>
    %cst_67 = arith.constant -1.000000e+29 : f32
    %141 = vector.broadcast %cst_67 : f32 to vector<1x10xf32>
    %142 = arith.cmpf ogt, %140, %141 : vector<1x10xf32>
    %cst_68 = arith.constant 0.000000e+00 : f32
    %143 = vector.broadcast %cst_68 : f32 to vector<1x10xf32>
    %144 = arith.select %142, %140, %143 : vector<1x10xi1>, vector<1x10xf32>
    %145 = vector.broadcast %144 : vector<1x10xf32> to vector<16x10xf32>
    %146 = arith.subf %138, %145 : vector<16x10xf32>
    %147 = math.exp %146 : vector<16x10xf32>
    %cst_69 = arith.constant dense<0.000000e+00> : vector<10xf32>
    %148 = vector.multi_reduction <add>, %147, %cst_69 [0] : vector<16x10xf32> to vector<10xf32>
    %149 = vector.shape_cast %148 : vector<10xf32> to vector<1x10xf32>
    %cst_70 = arith.constant 0.000000e+00 : f32
    %150 = vector.broadcast %cst_70 : f32 to vector<1x10xf32>
    %151 = arith.cmpf ogt, %149, %150 : vector<1x10xf32>
    %152 = tpu.reciprocal %149 {approx = true} : vector<1x10xf32> -> vector<1x10xf32>
    %cst_71 = arith.constant 0.000000e+00 : f32
    %153 = vector.broadcast %cst_71 : f32 to vector<1x10xf32>
    %154 = arith.select %151, %152, %153 : vector<1x10xi1>, vector<1x10xf32>
    %155 = vector.broadcast %154 : vector<1x10xf32> to vector<16x10xf32>
    %156 = arith.mulf %147, %155 : vector<16x10xf32>
    %cst_72 = arith.constant dense<0.000000e+00> : vector<10x16xf32>
    %157 = tpu.matmul %156, %124, %cst_72 {dimension_numbers = #tpu.dot_dimension_numbers<[0], [0], [1], [1], [0, 1, 1, 1], [], []>} : vector<16x10xf32>, vector<16x16xf32>, vector<10x16xf32> -> vector<10x16xf32>
    %158 = vector.broadcast %39 : vector<10x1xf32> to vector<10x16xf32>
    %159 = arith.mulf %157, %158 : vector<10x16xf32>
    %cst_73 = arith.constant dense<0.000000e+00> : vector<16x16xf32>
    %160 = tpu.matmul %156, %159, %cst_73 {dimension_numbers = #tpu.dot_dimension_numbers<[1], [0], [0], [1], [0, 0, 1, 1], [], []>} : vector<16x10xf32>, vector<10x16xf32>, vector<16x16xf32> -> vector<16x16xf32>
    %161 = vector.broadcast %34 : vector<16x1xf32> to vector<16x16xf32>
    %162 = arith.mulf %161, %160 : vector<16x16xf32>
    %163 = vector.extract_strided_slice %40 {offsets = [32, 0], sizes = [16, 2], strides = [1, 1]} : vector<48x2xf32> to vector<16x2xf32>
    %cst_74 = arith.constant dense<0.000000e+00> : vector<16x2xf32>
    %164 = tpu.matmul %162, %163, %cst_74 {dimension_numbers = #tpu.dot_dimension_numbers<[1], [0], [0], [1], [0, 0, 1, 1], [], []>} : vector<16x16xf32>, vector<16x2xf32>, vector<16x2xf32> -> vector<16x2xf32>
    %165 = arith.addf %123, %164 : vector<16x2xf32>
    %c0_75 = arith.constant 0 : index
    %c0_76 = arith.constant 0 : index
    %166 = vector.load %arg10[%c0_75, %c0_76] : memref<1x2xf32, #tpu.memory_space<vmem>>, vector<1x2xf32>
    %167 = vector.broadcast %166 : vector<1x2xf32> to vector<16x2xf32>
    %168 = arith.addf %165, %167 : vector<16x2xf32>
    %cst_77 = arith.constant dense<0.000000e+00> : vector<2x10xf32>
    %169 = tpu.matmul %168, %1, %cst_77 {dimension_numbers = #tpu.dot_dimension_numbers<[0], [0], [1], [1], [0, 1, 1, 1], [], []>} : vector<16x2xf32>, vector<16x10xf32>, vector<2x10xf32> -> vector<2x10xf32>
    %c0_78 = arith.constant 0 : index
    %c0_79 = arith.constant 0 : index
    %170 = vector.load %arg11[%c0_78, %c0_79] : memref<2x1xf32, #tpu.memory_space<vmem>>, vector<2x1xf32>
    %171 = vector.broadcast %170 : vector<2x1xf32> to vector<2x10xf32>
    %172 = arith.addf %169, %171 : vector<2x10xf32>
    %c0_80 = arith.constant 0 : index
    %c0_81 = arith.constant 0 : index
    %173 = vector.load %arg12[%c0_80, %c0_81] : memref<2x10xf32, #tpu.memory_space<vmem>>, vector<2x10xf32>
    tpu.vector_store %arg12[%c0_80, %c0_81], %172 {strides = array<i32>} : memref<2x10xf32, #tpu.memory_space<vmem>>, vector<2x10xf32>,
    return
  }
}

</mosaic_0001>

<bundles_post_ra>
// kernel: tpu_custom_call.1
= control target key start
LH: loop header
LB: loop body
LE: loop exit
PB: predicated region body
PF: predicated region fallthrough
CT: control target
= control target key end

     0   :  { %vm62_vm0 = vcmask 1043456   ;;  %vm2444_vm1 = vmmov 1   ;;  %vm55_vm3 = vcmask 97280   ;;  %s2771_s0 = inlined_call_operand.vmem [shape: f32[16,12], index: 0, kind: input, shape index: {}]   ;;  %s2772_s1 = inlined_call_operand.vmem [shape: f32[16,10], index: 1, kind: input, shape index: {}]   ;;  %s2773_s2 = inlined_call_operand.vmem [shape: f32[12,32], index: 2, kind: input, shape index: {}]   ;;  %s2774_s3 = inlined_call_operand.vmem [shape: f32[1,32], index: 3, kind: input, shape index: {}]   ;;  %s2775_s4 = inlined_call_operand.vmem [shape: f32[16,32], index: 4, kind: input, shape index: {}]   ;;  %s2776_s5 = inlined_call_operand.vmem [shape: f32[1,32], index: 5, kind: input, shape index: {}]   ;;  %s2777_s6 = inlined_call_operand.vmem [shape: f32[32,48], index: 6, kind: input, shape index: {}]   ;;  %s2778_s7 = inlined_call_operand.vmem [shape: f32[48,3], index: 7, kind: input, shape index: {}]   ;;  %s2779_s8 = inlined_call_operand.vmem [shape: f32[3,48], index: 8, kind: input, shape index: {}]   ;;  %s2780_s9 = inlined_call_operand.vmem [shape: f32[48,2], index: 9, kind: input, shape index: {}]   ;;  %s2781_s10 = inlined_call_operand.vmem [shape: f32[1,2], index: 10, kind: input, shape index: {}]   ;;  %s2782_s11 = inlined_call_operand.vmem [shape: f32[2,1], index: 11, kind: input, shape index: {}]   ;;  %s2783_s12 = inlined_call_operand.hbm [shape: f32[2,10], index: 12, kind: output, shape index: {}]  }
   0x1   :  { %v2523_v0 = vld [vmem:[%s2772_s1] sm:$0xff]  ;;  %v47_v2 = vld [vmem:[%s2773_s2 + $0x8] sm:$0xf]  ;;  %vm2270_vm2 = vmpackc.low %vm62_vm0, %vm2444_vm1 }
   0x2   :  { %v46_v1 = vld [vmem:[%s2773_s2] sm:$0xff]  ;;  %152 = vxpose.xlu0.b32.start [1/2] (short) (narrow) %v2523_v0, 16  ;;  %v2536_v4 = vld [vmem:[%s2772_s1 + $0x8] sm:$0xff] }
   0x3   :  { %v2269_v3 = vpack.c.bf16 %v47_v2, %v46_v1  ;;  %v42_v5 = vld [vmem:[%s2771_s0] sm:$0xff]  ;;  %v2360_v6 = vpack.c.bf16 %v2536_v4, %v2523_v0  ;;  %v144_v8 = vld [vmem:[%s2775_s4 + $0x8] sm:$0xff] }
   0x4   :  { %2131 = vmatprep.mubr.msk.f32.mxu0 %vm55_vm3, %v42_v5  ;;  %v143_v7 = vld [vmem:[%s2775_s4] sm:$0xff] }
   0x5   :  { %2271 = vmatprep.subr.msk.bf16.mxu0 %vm2270_vm2, %v2269_v3 }
   0x6   :  { %17 = vsyncpa [#allocation3], 0  ;;  %2274 = vmatpush3.bf16.msk.msra.mxu0 %vm2270_vm2, %v2269_v3  ;;  %v43_v9 = vld [vmem:[%s2771_s0 + $0x8] sm:$0xff]  ;;  %v2275_v10 = vpack.c.bf16 %v144_v8, %v143_v7  ;;  %153 = vxpose.xlu0.b32.end [2/2] (short) (narrow) %v2536_v4, 16  ;;  %v266_v11 = vld [vmem:[%s2777_s6] sm:$0xff]  ;;  %vm184_vm4 = vcmask 130048   ;;  %v834_v58 = vlaneseq }
   0x7   :  { %v267_v12 = vld [vmem:[%s2777_s6 + $0x8] sm:$0xff]  ;;  %v268_v14 = vld [vmem:[%s2777_s6 + $0x10] sm:$0xff]  ;;  %v269_v15 = vld [vmem:[%s2777_s6 + $0x18] sm:$0xff]  ;;  %vm270_vm5 = vcmask 261120   ;;  %vm439_vm6 = vcmask 392192   ;;  %v2445_v41 = vmov 0.0|0.0  }
   0x8   :  { %2276 = vmatprep.subr.bf16.mxu1 %v2275_v10  ;;  %v2279_v13 = vpack.c.bf16 %v267_v12, %v266_v11  ;;  %v2283_v16 = vpack.c.bf16 %v269_v15, %v268_v14  ;;  %v2003_v19 = vld [vmem:[%s2774_s3] ss:$0 sm:$0xff]  ;;  %v434_v26 = vld [vmem:[%s2778_s7 + $0x8] sm:$0xff]  ;;  %v435_v27 = vld [vmem:[%s2778_s7 + $0x10] sm:$0xff]  ;;  %vm2446_vm7 = vmmov 0   ;;  %v2447_v43 = vmov 0.0  }
   0x9   :  { %2132 = vmatmul.mubr.msk.f32.vlgmr.msra.gmra.mrb[0].mxu0 %vm55_vm3, %v43_v9  ;;  %2278 = vmatpush3.bf16.msra.mxu1 %v2275_v10  ;;  %v433_v25 = vld [vmem:[%s2778_s7] sm:$0xff]  ;;  %v436_v30 = vld [vmem:[%s2778_s7 + $0x18] sm:$0xff]  ;;  %v438_v33 = vld [vmem:[%s2778_s7 + $0x28] sm:$0xff]  ;;  %v2448_v46 = vmov 1.0|1.0   ;;  %v2449_v47 = vmov 0  }
   0xa   :  { %2280 = vmatprep.subr.bf16.mxu0 %v2279_v13  ;;  %2288 = vmatprep.subr.bf16.mxu1 %v2279_v13  ;;  %v2295_v29 = vpack.c.bf16 %v434_v26, %v433_v25  ;;  %v2299_v31 = vpack.c.bf16 %v436_v30, %v435_v27  ;;  %v437_v32 = vld [vmem:[%s2778_s7 + $0x20] sm:$0xff]  ;;  %v2450_v48 = vmov 1   ;;  %vm614_vm8 = vcmask 1041408   ;;  %vm2309_vm9 = vmpackc.low %vm439_vm6, %vm439_vm6  ;;  %s2453_s17 = smov 96   ;;  %s2454_s29 = smov [#allocation2]  }
   0xb   :  { %2282 = vmatpush3.bf16.msra.mxu0 %v2279_v13  ;;  %v2303_v34 = vpack.c.bf16 %v438_v33, %v437_v32  ;;  %v2007_v35 = vld [vmem:[%s2776_s5] ss:$0 sm:$0xff]  ;;  %2377 = vset.pattern.permute.xlu1 %v2449_v47  ;;  %vm2606_vm10 = vmpackc.low %vm614_vm8, %vm2444_vm1  ;;  %vm601_vm11 = vcmp.ne.f32.partialorder %v2523_v0, 0.0  ;;  %vm602_vm12 = vcmp.ne.f32.partialorder %v2536_v4, 0.0  ;;  %vm607_vm13 = vcmask 80896   ;;  %s1995_s3 = sshll.u32 %s2454_s29, 4  ;;  %s1996_s3 = int_to_ptr.vmem [resolvable:$true] %s1995_s3 }
   0xc   :  { %2284 = vmatprep.subr.bf16.mxu0 %v2283_v16  ;;  %v521_v53 = vld [vmem:[%s2779_s8] sm:$0x7]  ;;  %v2618_v54 = vsel %vm601_vm11, 1.0, %v2447_v43  ;;  %v2626_v55 = vsel %vm602_vm12, 1.0, %v2447_v43  ;;  %s2451_s8 = smov 112   ;;  %v835_v59 = vshrl.u32 %v834_v58, 7  ;;  %p2425_p1 = scmp.lt.s32.totalorder %s1996_s3, %s1996_s3 }
   0xd   :  { %vm846_vm14 = vcmp.gt.f32.partialorder %v2618_v54, 0.0  ;;  %vm847_vm15 = vcmp.gt.f32.partialorder %v2626_v55, 0.0  ;;  %s2420_s30 = scalar_lea.vmem %s1996_s3, 32 }
   0xe   :  { %v836_v62 = vsub.s32 0, %v835_v59  ;;  %v1112_v63 = vsub.s32 1, %v835_v59  ;;  %v1534_v1 = vsub.s32 2, %v835_v59  ;;  %p2421_p0 = scmp.ne.s32.totalorder %s1996_s3, %s2420_s30  ;;  %p2426_p2 = scmp.lt.s32.totalorder %s2420_s30, %s2420_s30 }
   0xf   :  { %2286 = vmatpush3.bf16.msra.mxu0 %v2283_v16 }
  0x10   :  { %2296 = vmatprep.subr.bf16.mxu0 %v2295_v29  ;;  %p2427_p3 = por %p2426_p2, %p2425_p1 }
  0x12   :  { %p2428_p4 = pnand %p2427_p3, %p2421_p0 }
  0x2f   :  { %2378 = vset.pattern.permute.xlu0 %v2450_v48 }
  0x82   :  { %v168_v17 = vpop.trf.xlu0 }
  0x83   :  { %2138 = vmatprep.mubr.msk.f32.mxu1 %vm184_vm4, %v168_v17 }
  0x86   :  { %v169_v18 = vpop.trf.xlu0 }
  0x87   :  { %2139 = vmatmul.mubr.msk.f32.vlgmr.msra.gmra.mrb[0].mxu1 %vm184_vm4, %v169_v18 }
  0x88   :  { %2290 = vmatpush3.bf16.msra.mxu1 %v2279_v13 }
  0x89   :  { %2292 = vmatprep.subr.bf16.mxu1 %v2283_v16 }
  0x8c   :  { %2294 = vmatpush3.bf16.msra.mxu1 %v2283_v16 }
  0x8d   :  { %2307 = vmatprep.subr.bf16.mxu1 %v2445_v41 }
  0xdc   :  { %v2133_v20 = vpop.f32.mrb[0].mxu0 }
  0xdd   :  { %v138_v21 = vadd.f32 %v2133_v20, %v2003_v19  ;;  %v132_v22 = vpop.f32.mrb[1].mxu0 }
  0xde   :  { %v133_v23 = vadd.f32 %v2003_v19, %v132_v22 }
  0xdf   :  { %v142_v28 = vmax.f32 %v138_v21, 0.0 }
  0xe0   :  { %v141_v24 = vmax.f32 %v133_v23, 0.0 }
  0xe2   :  { %2149 = vmatprep.mubr.msk.f32.mxu0 %vm270_vm5, %v141_v24 }
  0xe3   :  { %2150 = vmatmul.mubr.msk.f32.vlgmr.msra.gmra.mrb[2].mxu0 %vm270_vm5, %v142_v28 }
  0xe4   :  { %2298 = vmatpush3.bf16.msra.mxu0 %v2295_v29 }
  0xe5   :  { %2300 = vmatprep.subr.bf16.mxu0 %v2299_v31 }
  0xe8   :  { %2302 = vmatpush3.bf16.msra.mxu0 %v2299_v31 }
  0xe9   :  { %2304 = vmatprep.subr.bf16.mxu0 %v2303_v34 }
  0xec   :  { %2306 = vmatpush3.bf16.msra.mxu0 %v2303_v34 }
  0xed   :  { %2315 = vmatprep.subr.bf16.mxu0 %v2448_v46 }
 0x15a   :  { %v2140_v36 = vpop.f32.mrb[0].mxu1 }
 0x15b   :  { %v263_v37 = vadd.f32 %v2140_v36, %v2007_v35  ;;  %v257_v38 = vpop.f32.mrb[1].mxu1 }
 0x15c   :  { %v258_v39 = vadd.f32 %v2007_v35, %v257_v38 }
 0x15e   :  { %2160 = vmatprep.mubr.msk.f32.mxu1 %vm270_vm5, %v258_v39 }
 0x15f   :  { %2161 = vmatmul.mubr.msk.f32.vlgmr.msra.gmra.mrb[2].mxu1 %vm270_vm5, %v263_v37 }
 0x160   :  { %2182 = vmatprep.mubr.msk.f32.mxu1 %vm2446_vm7, %v2447_v43 }
 0x1b6   :  { %v2151_v40 = vpop.f32.mrb[2].mxu0 }
 0x1b7   :  { %v343_v42 = vpop.f32.mrb[3].mxu0 }
 0x1b8   :  { %2175 = vmatprep.mubr.msk.f32.mxu0 %vm439_vm6, %v343_v42  ;;  %v2317_v44 = vpack.c.bf16 %v2151_v40, %v343_v42  ;;  %v2599_v45 = vpack.i.bf16 %v2151_v40, %v343_v42 }
 0x1b9   :  { %2176 = vmatmul.mubr.msk.f32.vlgmr.msra.gmra.mrb[4].mxu0 %vm439_vm6, %v2151_v40 }
 0x1ba   :  { %2316 = vmatpush3.bf16.msra.mxu0 %v2448_v46 }
 0x232   :  { %v2162_v49 = vpop.f32.mrb[2].mxu1 }
 0x233   :  { %v424_v50 = vpop.f32.mrb[3].mxu1 }
 0x234   :  { %v2308_v52 = vpack.c.bf16 %v2162_v49, %v424_v50 }
 0x236   :  { %2310 = vmatpush3.bf16.xpose.msk.msra.mxu1 %vm2309_vm9, %v2308_v52 }
 0x237   :  { %2312 = vmatprep.subr.msk.bf16.mxu1 %vm2606_vm10, %v2448_v46 }
 0x23d   :  { %2183 = vmatmul.mubr.msk.f32.vlgmr.msra.gmra.mrb[4].mxu1 %vm439_vm6, %v521_v53 }
 0x23e   :  { %2314 = vmatpush3.bf16.msk.msra.mxu1 %vm2606_vm10, %v2448_v46  ;;  %2189 = vmatprep.mubr.msk.f32.mxu1 %vm607_vm13, %v2618_v54 }
 0x23f   :  { %2318 = vmatprep.subr.bf16.mxu1 %v2317_v44 }
 0x241   :  { %2190 = vmatmul.mubr.msk.f32.vlgmr.msra.gmra.mrb[6].mxu1 %vm607_vm13, %v2626_v55 }
 0x242   :  { %2320 = vmatpush3.bf16.msra.mxu1 %v2317_v44 }
 0x28c   :  { %v2630_v56 = vpop.f32.mrb[4].mxu0 }
 0x28d   :  { %831 = vperm.xlu1 %2377, %v2630_v56   ;;  %v2633_v57 = vpop.f32.mrb[5].mxu0 }
 0x28e   :  { %1103 = vperm.xlu0 %2378, %v2633_v57  }
 0x291   :  { %826 = vperm.xlu1 %2377, %v2633_v57  }
 0x292   :  { %2381 = vrot.lane.b32.xlu0 %v2599_v45, %s2451_s8 }
 0x295   :  { %2379 = vset.pattern.permute.xlu1 %v2450_v48 }
 0x296   :  { %1107 = vperm.xlu1 %2379, %v2630_v56  }
 0x2bf   :  { %693 = vxpose.xlu1.b32.start [1/2] (short) (narrow) %v2618_v54, 16 }
 0x2c3   :  { %694 = vxpose.xlu1.b32.end [2/2] (short) (narrow) %v2626_v55, 16 }
 0x30c   :  { %v832_v60 = vpop.permute.xlu1 %831 }
 0x30d   :  { %v1104_v61 = vpop.permute.xlu0 %1103 }
 0x310   :  { %v827_v2 = vpop.permute.xlu1 %826  ;;  %v597_v3 = vpop.f32.mrb[4].mxu1 }
 0x311   :  { %v2382_v5 = vpop.permute.xlu0 %2381  ;;  %v837_v7 = vrot.slane %v597_v3, %v836_v62  ;;  %v1113_v10 = vrot.slane %v597_v3, %v1112_v63  ;;  %v2184_v11 = vpop.f32.mrb[5].mxu1  ;;  %v2641_v12 = vrot.slane %v597_v3, %v1534_v1 }
 0x312   :  { %v2384_v8 = vunpack.i.h.bf16 %v2382_v5  ;;  %v2383_v9 = vunpack.i.l.bf16 %v2382_v5 }
 0x313   :  { %v838_v13 = vadd.f32 %v837_v7, %v827_v2  ;;  %v839_v14 = vadd.f32 %v837_v7, %v832_v60  ;;  %v1114_v16 = vadd.f32 %v1113_v10, %v1104_v61 }
 0x314   :  { %v2643_v15 = vpack.c.bf16 %v2384_v8, %v2383_v9 }
 0x315   :  { %v1108_v17 = vpop.permute.xlu1 %1107  ;;  %vm840_vm0 = vcmp.gt.f32.partialorder %v838_v13, 0.0  ;;  %vm841_vm1 = vcmp.gt.f32.partialorder %v839_v14, 0.0  ;;  %v842_v18 = vmul.f32 0.2, %v838_v13  ;;  %v843_v19 = vmul.f32 0.2, %v839_v14 }
 0x316   :  { %2328 = vmatprep.subr.bf16.mxu1 %v2643_v15  ;;  %vm1116_vm2 = vcmp.gt.f32.partialorder %v1114_v16, 0.0  ;;  %v1118_v20 = vmul.f32 0.2, %v1114_v16  ;;  %v1115_v21 = vadd.f32 %v1113_v10, %v1108_v17 }
 0x317   :  { %v844_v22 = vsel %vm840_vm0, %v838_v13, %v842_v18  ;;  %v845_v23 = vsel %vm841_vm1, %v839_v14, %v843_v19 }
 0x318   :  { %v848_v24 = vsel %vm846_vm14, %v844_v22, -1e+30  ;;  %v849_v25 = vsel %vm847_vm15, %v845_v23, -1e+30  ;;  %v1120_v26 = vsel %vm1116_vm2, %v1114_v16, %v1118_v20  ;;  %vm1117_vm3 = vcmp.gt.f32.partialorder %v1115_v21, 0.0 }
 0x319   :  { %v850_v27 = vsel %vm607_vm13, %v848_v24, -inf  ;;  %v851_v28 = vsel %vm607_vm13, %v849_v25, -inf  ;;  %v1119_v29 = vmul.f32 0.2, %v1115_v21  ;;  %v1122_v31 = vsel %vm846_vm14, %v1120_v26, -1e+30 }
 0x31a   :  { %v852_v30 = vmax.f32 %v850_v27, %v851_v28  ;;  %v1124_v35 = vsel %vm607_vm13, %v1122_v31, -inf }
 0x31b   :  { %v1121_v32 = vsel %vm1117_vm3, %v1115_v21, %v1119_v29 }
 0x31c   :  { %v853_v33 = vrot.slane %v852_v30, 4  ;;  %v1123_v34 = vsel %vm847_vm15, %v1121_v32, -1e+30 }
 0x31d   :  { %v1125_v36 = vsel %vm607_vm13, %v1123_v34, -inf }
 0x31e   :  { %v854_v37 = vmax.f32 %v852_v30, %v853_v33  ;;  %v1126_v38 = vmax.f32 %v1124_v35, %v1125_v36 }
 0x320   :  { %v855_v39 = vrot.slane %v854_v37, 2  ;;  %v1127_v40 = vrot.slane %v1126_v38, 4 }
 0x322   :  { %v856_v42 = vmax.f32 %v854_v37, %v855_v39  ;;  %v1128_v44 = vmax.f32 %v1126_v38, %v1127_v40 }
 0x324   :  { %v857_v46 = vrot.slane %v856_v42, 1  ;;  %v1129_v48 = vrot.slane %v1128_v44, 2 }
 0x326   :  { %v858_v49 = vmax.f32 %v856_v42, %v857_v46  ;;  %v1130_v50 = vmax.f32 %v1128_v44, %v1129_v48  ;;  %v2452_v42 = vmov 2  }
 0x328   :  { %vm859_vm5 = vcmp.gt.f32.partialorder %v858_v49, -1e+29  ;;  %v1131_v52 = vrot.slane %v1130_v50, 1 }
 0x329   :  { %v860_v53 = vsel %vm859_vm5, %v858_v49, 0.0 }
 0x32a   :  { %v861_v58 = vsub.f32 %v848_v24, %v860_v53  ;;  %v862_v59 = vsub.f32 %v849_v25, %v860_v53  ;;  %v1132_v60 = vmax.f32 %v1130_v50, %v1131_v52 }
 0x32c   :  { %v863_v61 = vmul.f32 1.442695, %v861_v58  ;;  %v865_v62 = vmul.f32 1.442695, %v862_v59  ;;  %vm1133_vm6 = vcmp.gt.f32.partialorder %v1132_v60, -1e+29 }
 0x32d   :  { %v1134_v63 = vsel %vm1133_vm6, %v1132_v60, 0.0 }
 0x32e   :  { %2394 = vpow2.f32 %v863_v61  ;;  %v1135_v1 = vsub.f32 %v1122_v31, %v1134_v63  ;;  %v1136_v2 = vsub.f32 %v1123_v34, %v1134_v63 }
 0x32f   :  { %2396 = vpow2.f32 %v865_v62 }
 0x330   :  { %v1137_v3 = vmul.f32 1.442695, %v1135_v1  ;;  %v1139_v5 = vmul.f32 1.442695, %v1136_v2 }
 0x332   :  { %2398 = vpow2.f32 %v1137_v3 }
 0x333   :  { %2400 = vpow2.f32 %v1139_v5 }
 0x338   :  { %v2395_v7 = vpop.eup %2394 }
 0x339   :  { %v2397_v8 = vpop.eup %2396  ;;  %v867_v9 = vsel %vm607_vm13, %v2395_v7, 0.0 }
 0x33a   :  { %v868_v10 = vsel %vm607_vm13, %v2397_v8, 0.0 }
 0x33b   :  { %v869_v11 = vadd.f32 %v868_v10, %v867_v9 }
 0x33c   :  { %v2399_v13 = vpop.eup %2398 }
 0x33d   :  { %v2401_v14 = vpop.eup %2400  ;;  %v870_v16 = vrot.slane %v869_v11, 4  ;;  %v1141_v17 = vsel %vm607_vm13, %v2399_v13, 0.0 }
 0x33e   :  { %v1142_v19 = vsel %vm607_vm13, %v2401_v14, 0.0 }
 0x33f   :  { %v709_v18 = vpop.trf.xlu1  ;;  %v871_v20 = vadd.f32 %v870_v16, %v869_v11  ;;  %v1143_v21 = vadd.f32 %v1142_v19, %v1141_v17 }
 0x340   :  { %2196 = vmatprep.mubr.msk.f32.mxu0 %vm184_vm4, %v709_v18 }
 0x341   :  { %v872_v22 = vrot.slane %v871_v20, 2  ;;  %v1144_v23 = vrot.slane %v1143_v21, 4 }
 0x343   :  { %v710_v24 = vpop.trf.xlu1  ;;  %v873_v25 = vadd.f32 %v872_v22, %v871_v20  ;;  %v1145_v26 = vadd.f32 %v1144_v23, %v1143_v21 }
 0x344   :  { %2197 = vmatmul.mubr.msk.f32.vlgmr.msra.gmra.mrb[6].mxu0 %vm184_vm4, %v710_v24  ;;  %v2191_v24 = vpop.f32.mrb[6].mxu1 }
 0x345   :  { %v874_v27 = vrot.slane %v873_v25, 1  ;;  %v1146_v28 = vrot.slane %v1145_v26, 2  ;;  %vm807_vm2 = vcmp.gt.f32.partialorder %v2191_v24, 0.0 }
 0x347   :  { %v875_v29 = vadd.f32 %v874_v27, %v873_v25  ;;  %v1147_v30 = vadd.f32 %v1146_v28, %v1145_v26  ;;  %v684_v26 = vpop.f32.mrb[7].mxu1 }
 0x348   :  { %vm806_vm1 = vcmp.gt.f32.partialorder %v684_v26, 0.0 }
 0x349   :  { %2402 = vrcp.f32 %v875_v29  ;;  %v1148_v31 = vrot.slane %v1147_v30, 1  ;;  %vm876_vm8 = vcmp.gt.f32.partialorder %v875_v29, 0.0 }
 0x34b   :  { %v1149_v32 = vadd.f32 %v1148_v31, %v1147_v30 }
 0x34d   :  { %2404 = vrcp.f32 %v1149_v32  ;;  %vm1150_vm9 = vcmp.gt.f32.partialorder %v1149_v32, 0.0 }
 0x353   :  { %v2403_v33 = vpop.eup %2402 }
 0x354   :  { %v878_v34 = vsel %vm876_vm8, %v2403_v33, 0.0 }
 0x355   :  { %v879_v35 = vmul.f32 %v2395_v7, %v878_v34  ;;  %v2667_v38 = vmul.f32 %v2397_v8, %v878_v34 }
 0x357   :  { %v2405_v36 = vpop.eup %2404  ;;  %881 = vxpose.xlu0.b32.start [1/2] (short) (narrow) %v879_v35, 16  ;;  %2210 = vmatprep.mubr.msk.f32.mxu0 %vm607_vm13, %v879_v35 }
 0x358   :  { %v1152_v37 = vsel %vm1150_vm9, %v2405_v36, 0.0 }
 0x359   :  { %v2669_v39 = vmul.f32 %v2399_v13, %v1152_v37  ;;  %v2673_v40 = vmul.f32 %v2401_v14, %v1152_v37 }
 0x35b   :  { %1155 = vxpose.xlu1.b32.start [1/2] (short) (narrow) %v2669_v39, 16  ;;  %882 = vxpose.xlu0.b32.end [2/2] (short) (narrow) %v2667_v38, 16 }
 0x35f   :  { %1156 = vxpose.xlu1.b32.end [2/2] (short) (narrow) %v2673_v40, 16 }
 0x37d   :  { %2385 = vset.pattern.permute.xlu1 %v2452_v42 }
 0x37e   :  { %1525 = vperm.xlu1 %2385, %v2633_v57  }
 0x382   :  { %2387 = vset.pattern.permute.xlu1 %v2449_v47 }
 0x384   :  { %2386 = vset.pattern.permute.xlu0 %v2452_v42 }
 0x385   :  { %1529 = vperm.xlu0 %2386, %v2630_v56  }
 0x389   :  { %2393 = vset.pattern.permute.xlu0 %v2449_v47 }
 0x3d7   :  { %v897_v44 = vpop.trf.xlu0 }
 0x3d8   :  { %2203 = vmatprep.mubr.msk.f32.mxu1 %vm184_vm4, %v897_v44  ;;  %v1876_v44 = vld [vmem:[%s2782_s11] sm:$0x3] }
 0x3db   :  { %v898_v46 = vpop.trf.xlu0  ;;  %v1171_v48 = vpop.trf.xlu1 }
 0x3dc   :  { %2204 = vmatmul.mubr.msk.f32.vlgmr.msra.gmra.mrb[8].mxu1 %vm184_vm4, %v898_v46 }
 0x3dd   :  { %2330 = vmatpush3.bf16.msra.mxu1 %v2643_v15  ;;  %2217 = vmatprep.mubr.msk.f32.mxu1 %vm184_vm4, %v1171_v48 }
 0x3df   :  { %v1172_v49 = vpop.trf.xlu1 }
 0x3e0   :  { %2218 = vmatmul.mubr.msk.f32.vlgmr.msra.gmra.mrb[10].mxu1 %vm184_vm4, %v1172_v49 }
 0x3fd   :  { %v1526_v57 = vpop.permute.xlu1 %1525 }
 0x3fe   :  { %v1536_v50 = vadd.f32 %v2641_v12, %v1526_v57 }
 0x400   :  { %v1540_v56 = vmul.f32 0.2, %v1536_v50  ;;  %vm1538_vm11 = vcmp.gt.f32.partialorder %v1536_v50, 0.0 }
 0x402   :  { %v1542_v52 = vsel %vm1538_vm11, %v1536_v50, %v1540_v56 }
 0x403   :  { %v1544_v59 = vsel %vm846_vm14, %v1542_v52, -1e+30 }
 0x404   :  { %v1530_v47 = vpop.permute.xlu0 %1529  ;;  %v1546_v61 = vsel %vm607_vm13, %v1544_v59, -inf }
 0x405   :  { %v1537_v53 = vadd.f32 %v2641_v12, %v1530_v47 }
 0x407   :  { %vm1539_vm12 = vcmp.gt.f32.partialorder %v1537_v53, 0.0  ;;  %v1541_v58 = vmul.f32 0.2, %v1537_v53 }
 0x409   :  { %v1543_v15 = vsel %vm1539_vm12, %v1537_v53, %v1541_v58 }
 0x40a   :  { %v1545_v60 = vsel %vm847_vm15, %v1543_v15, -1e+30 }
 0x40b   :  { %v1547_v62 = vsel %vm607_vm13, %v1545_v60, -inf }
 0x40c   :  { %v1548_v63 = vmax.f32 %v1546_v61, %v1547_v62 }
 0x40e   :  { %v1549_v1 = vrot.slane %v1548_v63, 4 }
 0x410   :  { %v1550_v2 = vmax.f32 %v1548_v63, %v1549_v1 }
 0x412   :  { %v1551_v3 = vrot.slane %v1550_v2, 2 }
 0x414   :  { %v1552_v5 = vmax.f32 %v1550_v2, %v1551_v3 }
 0x416   :  { %v1553_v7 = vrot.slane %v1552_v5, 1 }
 0x417   :  { %v2198_v12 = vpop.f32.mrb[6].mxu0 }
 0x418   :  { %v797_v8 = vpop.f32.mrb[7].mxu0  ;;  %v1554_v9 = vmax.f32 %v1552_v5, %v1553_v7  ;;  %vm813_vm15 = vcmp.gt.f32.partialorder %v2198_v12, 0.0  ;;  %v819_v5 = vld [vmem:[%s2780_s9 + $0x8] sm:$0xff] }
 0x419   :  { %2406 = vrcp.f32 %v797_v8  ;;  %vm812_vm14 = vcmp.gt.f32.partialorder %v797_v8, 0.0 }
 0x41a   :  { %vm1555_vm0 = vcmp.gt.f32.partialorder %v1554_v9, -1e+29  ;;  %2408 = vrcp.f32 %v2198_v12 }
 0x41b   :  { %v1556_v54 = vsel %vm1555_vm0, %v1554_v9, 0.0 }
 0x41c   :  { %v1557_v10 = vsub.f32 %v1544_v59, %v1556_v54  ;;  %v1558_v55 = vsub.f32 %v1545_v60, %v1556_v54 }
 0x41e   :  { %v1559_v11 = vmul.f32 1.442695, %v1557_v10  ;;  %v1561_v13 = vmul.f32 1.442695, %v1558_v55  ;;  %v822_v10 = vld [vmem:[%s2780_s9 + $0x20] sm:$0xff]  ;;  %v823_v55 = vld [vmem:[%s2780_s9 + $0x28] sm:$0xff] }
 0x420   :  { %2410 = vpow2.f32 %v1559_v11 }
 0x421   :  { %2412 = vpow2.f32 %v1561_v13 }
 0x422   :  { %2414 = vrcp.f32 %v684_v26 }
 0x423   :  { %v2407_v14 = vpop.eup %2406  ;;  %2416 = vrcp.f32 %v2191_v24 }
 0x424   :  { %v816_v16 = vsel %vm812_vm14, %v2407_v14, 0.0  ;;  %v2409_v17 = vpop.eup %2408 }
 0x425   :  { %996 = vperm.xlu1 %2387, %v816_v16   ;;  %v817_v18 = vsel %vm813_vm15, %v2409_v17, 0.0  ;;  %v2355_v17 = vpack.c.bf16 %v823_v55, %v822_v10 }
 0x429   :  { %1001 = vperm.xlu1 %2387, %v817_v18  }
 0x42a   :  { %v2411_v19 = vpop.eup %2410 }
 0x42b   :  { %v2413_v20 = vpop.eup %2412  ;;  %v1563_v21 = vsel %vm607_vm13, %v2411_v19, 0.0 }
 0x42c   :  { %v1564_v22 = vsel %vm607_vm13, %v2413_v20, 0.0  ;;  %v2415_v30 = vpop.eup %2414 }
 0x42d   :  { %2389 = vrot.lane.b32.xlu1 %v2599_v45, %s2453_s17  ;;  %v1565_v23 = vadd.f32 %v1564_v22, %v1563_v21  ;;  %v2417_v32 = vpop.eup %2416  ;;  %v810_v33 = vsel %vm806_vm1, %v2415_v30, 0.0 }
 0x42e   :  { %1092 = vperm.xlu0 %2393, %v810_v33   ;;  %v811_v45 = vsel %vm807_vm2, %v2417_v32, 0.0 }
 0x42f   :  { %v1566_v25 = vrot.slane %v1565_v23, 4 }
 0x431   :  { %v1567_v27 = vadd.f32 %v1566_v25, %v1565_v23 }
 0x432   :  { %1097 = vperm.xlu0 %2393, %v811_v45  }
 0x433   :  { %v1568_v28 = vrot.slane %v1567_v27, 2 }
 0x435   :  { %v1569_v29 = vadd.f32 %v1568_v28, %v1567_v27 }
 0x437   :  { %v1570_v31 = vrot.slane %v1569_v29, 1 }
 0x439   :  { %v1571_v34 = vadd.f32 %v1570_v31, %v1569_v29 }
 0x43b   :  { %2418 = vrcp.f32 %v1571_v34  ;;  %vm1572_vm3 = vcmp.gt.f32.partialorder %v1571_v34, 0.0 }
 0x445   :  { %v2419_v35 = vpop.eup %2418 }
 0x446   :  { %v1574_v36 = vsel %vm1572_vm3, %v2419_v35, 0.0 }
 0x447   :  { %v1575_v37 = vmul.f32 %v2411_v19, %v1574_v36  ;;  %v2696_v42 = vmul.f32 %v2413_v20, %v1574_v36 }
 0x456   :  { %1577 = vxpose.xlu1.b32.start [1/2] (short) (narrow) %v1575_v37, 16 }
 0x45a   :  { %1578 = vxpose.xlu1.b32.end [2/2] (short) (narrow) %v2696_v42, 16 }
 0x478   :  { %1879 = vperm.xlu1 %2387, %v1876_v44  }
 0x4a4   :  { %v997_v46 = vpop.permute.xlu1 %996 }
 0x4a8   :  { %v1002_v48 = vpop.permute.xlu1 %1001 }
 0x4ac   :  { %v2390_v47 = vpop.permute.xlu1 %2389 }
 0x4ad   :  { %v2392_v15 = vunpack.i.h.bf16 %v2390_v47  ;;  %v2391_v60 = vunpack.i.l.bf16 %v2390_v47  ;;  %v1093_v12 = vpop.permute.xlu0 %1092 }
 0x4af   :  { %v2205_v49 = vpop.f32.mrb[8].mxu1  ;;  %v2345_v63 = vpack.c.bf16 %v2392_v15, %v2391_v60 }
 0x4b0   :  { %v1005_v57 = vmul.f32 %v2205_v49, %v1002_v48  ;;  %v985_v50 = vpop.f32.mrb[9].mxu1 }
 0x4b1   :  { %v1004_v56 = vmul.f32 %v997_v46, %v985_v50  ;;  %v1098_v13 = vpop.permute.xlu0 %1097 }
 0x4b3   :  { %v2321_v52 = vpack.c.bf16 %v1005_v57, %v1004_v56  ;;  %v2219_v53 = vpop.f32.mrb[10].mxu1 }
 0x4b4   :  { %v1275_v58 = vmul.f32 %v2219_v53, %v1002_v48  ;;  %v1265_v59 = vpop.f32.mrb[11].mxu1 }
 0x4b5   :  { %v1274_v61 = vmul.f32 %v1265_v59, %v997_v46  ;;  %2323 = vmatprep.subr.msk.bf16.mxu0 %vm2606_vm10, %v2321_v52 }
 0x4b6   :  { %2326 = vmatpush3.bf16.msk.msra.mxu0 %vm2606_vm10, %v2321_v52 }
 0x4b7   :  { %v2331_v62 = vpack.c.bf16 %v1275_v58, %v1274_v61 }
 0x4b9   :  { %2211 = vmatmul.mubr.msk.f32.vlgmr.msra.gmra.mrb[8].mxu0 %vm607_vm13, %v2667_v38  ;;  %2333 = vmatprep.subr.msk.bf16.mxu0 %vm2606_vm10, %v2331_v62  ;;  %v820_v38 = vld [vmem:[%s2780_s9 + $0x10] sm:$0xff] }
 0x4ba   :  { %2336 = vmatpush3.bf16.msk.msra.mxu0 %vm2606_vm10, %v2331_v62  ;;  %2224 = vmatprep.mubr.msk.f32.mxu0 %vm607_vm13, %v2669_v39  ;;  %v821_v39 = vld [vmem:[%s2780_s9 + $0x18] sm:$0xff] }
 0x4bb   :  { %2346 = vmatprep.subr.bf16.mxu0 %v2345_v63  ;;  %v2337_v3 = vpack.c.bf16 %v821_v39, %v820_v38 }
 0x4bd   :  { %2225 = vmatmul.mubr.msk.f32.vlgmr.msra.gmra.mrb[10].mxu0 %vm607_vm13, %v2673_v40  ;;  %2338 = vmatprep.subr.bf16.mxu1 %v2337_v3  ;;  %v818_v40 = vld [vmem:[%s2780_s9] sm:$0xff] }
 0x4be   :  { %2348 = vmatpush3.bf16.msra.mxu0 %v2345_v63  ;;  %2340 = vmatpush3.bf16.msra.mxu1 %v2337_v3  ;;  %v2341_v7 = vpack.c.bf16 %v819_v5, %v818_v40 }
 0x4c0   :  { %2342 = vmatprep.subr.bf16.mxu1 %v2341_v7 }
 0x4d6   :  { %v1593_v1 = vpop.trf.xlu1 }
 0x4d7   :  { %2245 = vmatprep.mubr.msk.f32.mxu0 %vm184_vm4, %v1593_v1 }
 0x4da   :  { %v1594_v2 = vpop.trf.xlu1 }
 0x4db   :  { %2246 = vmatmul.mubr.msk.f32.vlgmr.msra.gmra.mrb[12].mxu0 %vm184_vm4, %v1594_v2 }
 0x4dc   :  { %2252 = vmatprep.mubr.msk.f32.mxu0 %vm607_vm13, %v1575_v37 }
 0x58c   :  { %v2212_v8 = vpop.f32.mrb[8].mxu0 }
 0x58d   :  { %v1081_v9 = vpop.f32.mrb[9].mxu0  ;;  %v1101_v19 = vmul.f32 %v2212_v8, %v1098_v13 }
 0x58e   :  { %v1100_v18 = vmul.f32 %v1093_v12, %v1081_v9 }
 0x590   :  { %v2226_v54 = vpop.f32.mrb[10].mxu0 }
 0x591   :  { %v1351_v11 = vpop.f32.mrb[11].mxu0  ;;  %v1361_v16 = vmul.f32 %v2226_v54, %v1098_v13 }
 0x592   :  { %v1360_v14 = vmul.f32 %v1351_v11, %v1093_v12 }
 0x594   :  { %2231 = vmatprep.mubr.msk.f32.mxu1 %vm184_vm4, %v1360_v14 }
 0x595   :  { %2232 = vmatmul.mubr.msk.f32.vlgmr.msra.gmra.mrb[12].mxu1 %vm184_vm4, %v1361_v16 }
 0x596   :  { %2238 = vmatprep.mubr.msk.f32.mxu1 %vm184_vm4, %v1100_v18  ;;  %2344 = vmatpush3.bf16.msra.mxu1 %v2341_v7 }
 0x597   :  { %2356 = vmatprep.subr.bf16.mxu1 %v2355_v17 }
 0x59d   :  { %2239 = vmatmul.mubr.msk.f32.vlgmr.msra.gmra.mrb[12].mxu1 %vm184_vm4, %v1101_v19 }
 0x59e   :  { %2358 = vmatpush3.bf16.msra.mxu1 %v2355_v17 }
 0x5ae   :  { %v2247_v20 = vpop.f32.mrb[12].mxu0 }
 0x5af   :  { %v1697_v21 = vmul.f32 %v2247_v20, %v1002_v48  ;;  %v1687_v22 = vpop.f32.mrb[13].mxu0 }
 0x5b0   :  { %v1696_v23 = vmul.f32 %v1687_v22, %v997_v46 }
 0x5b2   :  { %v2349_v24 = vpack.c.bf16 %v1697_v21, %v1696_v23 }
 0x5b4   :  { %2351 = vmatprep.subr.msk.bf16.mxu0 %vm2606_vm10, %v2349_v24 }
 0x5b5   :  { %2354 = vmatpush3.bf16.msk.msra.mxu0 %vm2606_vm10, %v2349_v24 }
 0x5b6   :  { %2359 = vmatprep.subr.bf16.mxu0 %v2445_v41  ;;  %v2047_v41 = vld [vmem:[%s2781_s10] ss:$0 sm:$0xff] }
 0x5b8   :  { %2253 = vmatmul.mubr.msk.f32.vlgmr.msra.gmra.mrb[14].mxu0 %vm607_vm13, %v2696_v42 }
 0x5b9   :  { %2361 = vmatpush3.bf16.msra.mxu0 %v2360_v6  ;;  %2266 = vmatprep.mubr.msk.f32.mxu0 %vm2446_vm7, %v2447_v43  ;;  %v1880_v6 = vpop.permute.xlu1 %1879  ;;  %vm1987_vm7 = vcmask 74752  }
 0x68b   :  { %v2254_v25 = vpop.f32.mrb[14].mxu0 }
 0x68c   :  { %v1773_v26 = vpop.f32.mrb[15].mxu0  ;;  %v1783_v28 = vmul.f32 %v2254_v25, %v1098_v13 }
 0x68d   :  { %v1782_v27 = vmul.f32 %v1773_v26, %v1093_v12 }
 0x68f   :  { %2259 = vmatprep.mubr.msk.f32.mxu1 %vm184_vm4, %v1782_v27 }
 0x690   :  { %2260 = vmatmul.mubr.msk.f32.vlgmr.msra.gmra.mrb[12].mxu1 %vm184_vm4, %v1783_v28 }
 0x763   :  { %v2261_v51 = vpop.f32.mrb[12].mxu1 }
 0x764   :  { %v1856_v29 = vpop.f32.mrb[13].mxu1  ;;  %v1875_v0 = vadd.f32 %v2261_v51, %v2047_v41 }
 0x765   :  { %v1874_v30 = vadd.f32 %v2047_v41, %v1856_v29 }
 0x767   :  { %1882 = vxpose.xlu0.b32.start [1/2] (short) (narrow) %v1874_v30, 8 }
 0x76b   :  { %1883 = vxpose.xlu0.b32.end [2/2] (short) (narrow) %v1875_v0, 8 }
 0x7e7   :  { %v1898_v4 = vpop.trf.xlu0 }
 0x7e8   :  { %2267 = vmatmul.mubr.msk.f32.vlgmr.msra.gmra.mrb[16].mxu0 %vm184_vm4, %v1898_v4 }
 0x8bb   :  { %v1983_v43 = vpop.f32.mrb[16].mxu0 }
 0x8bc   :  { %v1984_v31 = vadd.f32 %v1983_v43, %v1880_v6  ;;  %v2268_v32 = vpop.f32.mrb[17].mxu0 }
 0x8be   :  { %1988 = vst.msk [vmem:[#allocation2] sm:$0x3] %vm1987_vm7, %v1984_v31 }
 0x8bf   :  { %2431 = shalt.err (!%p2428_p4)
}
 0x8c0   :  { %s2432_s13 = scalar_lea.hbm %s2783_s12, 32 }
 0x8c1   :  { %p2433_p5 = scmp.ne.s32.totalorder %s2783_s12, %s2432_s13  ;;  %p2436_p6 = scmp.lt.u32.totalorder %s2432_s13, %s2783_s12 }
 0x8c3   :  { %p2438_p7 = pnand %p2436_p6, %p2433_p5 }
 0x8c5   :  { %2441 = shalt.err (!%p2438_p7)
}
 0x8c6   :  { %1998 = dma.vmem_to_hbm [thread:$0]  %s1996_s3, 32, %s2783_s12, [#allocation3]  }
 0x8c7   :  { %2442 = dma.done.wait [#allocation3], 32  }
 0x8c8   :  { %2443 = vsyncadd [#allocation3], 4294967264 }
 0x8c9   :  { %2002 = vsyncpa [#allocation3], 1 }

</bundles_post_ra>
